<compile_context>
chip_gen: v6e
topology: v6e:2x2x1
jax: 0.10.0
libtpu: 0.0.40
codegen_flags: <defaults>
</compile_context>

<pallas_src>
import jax
import jax.numpy as jnp
from jax.experimental import pallas as pl
from jax.experimental.pallas import tpu as pltpu

# PyTorch module hidden sizes and their lane-aligned padded sizes.
H1, H2 = 400, 300
H1P, H2P = 512, 384
NEG_SLOPE = 0.01  # PyTorch leaky_relu default.


def _leaky_relu(x):
    # 2 VPU ops (mul + max) instead of 3 (cmp + mul + select); valid for
    # 0 < NEG_SLOPE < 1.
    return jnp.maximum(x, NEG_SLOPE * x)


def _round_up(n, m):
    return ((n + m - 1) // m) * m


def critic_td3_kernel(x_ref, u_ref,
                      w14_ref, b14_ref,
                      w2_ref, b2_ref, w5_ref, b5_ref,
                      w3_ref, w6_ref, b36_ref,
                      q_ref):
    """One batch tile of the fused twin-Q MLP.

    Layer 1 of both heads is a single MXU matmul over the in-kernel packed
    [x | u | 0] lhs with N = 2*H1P.  Layer 3 (N=1 per head) runs on the
    VPU/XLU (multiply + lane reduce).  MXU inputs are bf16; accumulation,
    bias adds and leaky_relu stay in f32.
    """
    tm = x_ref.shape[0]
    s = x_ref.shape[1]
    a = u_ref.shape[1]
    kp = w14_ref.shape[0]

    # Fused layer-1 lhs: [x | u | 0-pad] -> (TM, KP); cast once to bf16.
    pieces = [x_ref[...], u_ref[...]]
    if kp > s + a:                                    # static at trace time
        pieces.append(jnp.zeros((tm, kp - s - a), jnp.float32))
    xu = jnp.concatenate(pieces, axis=1).astype(jnp.bfloat16)

    # Layer 1, both heads in one MXU pass: (TM, 2*H1P), f32 accumulation.
    h14 = _leaky_relu(
        jnp.dot(xu, w14_ref[...], preferred_element_type=jnp.float32)
        + b14_ref[...])
    h1 = h14[:, :H1P].astype(jnp.bfloat16)            # head-1 activations
    h2 = h14[:, H1P:].astype(jnp.bfloat16)            # head-2 activations

    # Layer 2, per head.
    g1 = _leaky_relu(
        jnp.dot(h1, w2_ref[...], preferred_element_type=jnp.float32) + b2_ref[...])
    g2 = _leaky_relu(
        jnp.dot(h2, w5_ref[...], preferred_element_type=jnp.float32) + b5_ref[...])

    # Layer 3 (out_dim=1 per head): VPU multiply + XLU lane reduce.  Store
    # each Q column directly (no lane concat of width-1 columns).
    q1 = jnp.sum(g1 * w3_ref[...], axis=-1, keepdims=True)
    q2 = jnp.sum(g2 * w6_ref[...], axis=-1, keepdims=True)
    q_ref[:, 0:1] = q1 + b36_ref[:, 0:1]
    q_ref[:, 1:2] = q2 + b36_ref[:, 1:2]


@jax.jit
def critic_td3_forward(x, u, params):
    """x: (B, state_dim), u: (B, action_dim). Returns (q1, q2), each (B, 1)."""
    (w14p, b14, w2p, b2p, w5p, b5p, w3r, w6r, b36) = params
    x = x.astype(jnp.float32)
    u = u.astype(jnp.float32)
    B, S = x.shape
    A = u.shape[1]
    KP = w14p.shape[0]

    # Batch tiling: multiple of 8 sublanes, aim for >= 2 grid steps (v7x
    # megacore sharding), cap at 512 rows (amortizes per-step overhead).
    TM = min(512, max(8, _round_up((B + 1) // 2, 8)))
    B_pad = _round_up(B, TM)
    if B_pad != B:
        x = jnp.pad(x, ((0, B_pad - B), (0, 0)))
        u = jnp.pad(u, ((0, B_pad - B), (0, 0)))
    grid = (B_pad // TM,)

    batch_tile = lambda i: (i, 0)
    resident = lambda i: (0, 0)   # constant index: weights DMA'd once, stay in VMEM

    # Advisory cost hint for XLA's scheduler (this is a few-microsecond op).
    flops = 2 * B_pad * (KP * 2 * H1P + 2 * H1P * H2P + 2 * H2P)
    bytes_accessed = (B_pad * (S + A + 2) * 4            # x, u in; q out (f32)
                      + KP * 2 * H1P * 2                  # packed W1|W4 (bf16)
                      + 2 * H1P * H2P * 2                 # W2, W5 (bf16)
                      + (2 * H1P + 4 * H2P + 2) * 4)      # biases + w3/w6 rows

    q = pl.pallas_call(
        critic_td3_kernel,
        grid=grid,
        in_specs=[
            pl.BlockSpec((TM, S), batch_tile),         # x
            pl.BlockSpec((TM, A), batch_tile),         # u
            pl.BlockSpec((KP, 2 * H1P), resident),     # [W1 | W4] packed  bf16
            pl.BlockSpec((1, 2 * H1P), resident),      # [b1 | b4]         f32
            pl.BlockSpec((H1P, H2P), resident),        # W2                bf16
            pl.BlockSpec((1, H2P), resident),          # b2                f32
            pl.BlockSpec((H1P, H2P), resident),        # W5                bf16
            pl.BlockSpec((1, H2P), resident),          # b5                f32
            pl.BlockSpec((1, H2P), resident),          # w3 row            f32
            pl.BlockSpec((1, H2P), resident),          # w6 row            f32
            pl.BlockSpec((1, 2), resident),            # [b3, b6]          f32
        ],
        out_specs=pl.BlockSpec((TM, 2), batch_tile),
        out_shape=jax.ShapeDtypeStruct((B_pad, 2), jnp.float32),
        cost_estimate=pl.CostEstimate(flops=flops, transcendentals=0,
                                      bytes_accessed=bytes_accessed),
        compiler_params=pltpu.CompilerParams(
            dimension_semantics=("parallel",)),        # megacore sharding on v7x
    )(x, u, w14p, b14, w2p, b2p, w5p, b5p, w3r, w6r, b36)

    return q[:B, 0:1], q[:B, 1:2]


# ----------------------------------------------------------------------------
# Parameter init (PyTorch nn.Linear default: U[-1/sqrt(fan_in), 1/sqrt(fan_in)])
# in "natural" layout, plus packing into the padded/fused kernel layout.
# ----------------------------------------------------------------------------

def init_natural_params(key, state_dim, action_dim):
    """Weights stored as (in_features, out_features); biases as (out_features,)."""
    d_in = state_dim + action_dim
    dims = [(d_in, H1), (H1, H2), (H2, 1),   # l1, l2, l3
            (d_in, H1), (H1, H2), (H2, 1)]   # l4, l5, l6
    keys = jax.random.split(key, 2 * len(dims))
    params = []
    for n, (fi, fo) in enumerate(dims):
        bound = 1.0 / (fi ** 0.5)
        w = jax.random.uniform(keys[2 * n], (fi, fo), jnp.float32, -bound, bound)
        b = jax.random.uniform(keys[2 * n + 1], (fo,), jnp.float32, -bound, bound)
        params += [w, b]
    return tuple(params)


def _pad_to(a, shape):
    return jnp.pad(a, [(0, t - s) for s, t in zip(a.shape, shape)])


def pack_params(natural, state_dim, action_dim):
    """Pack natural params into the fused / lane-padded / bf16 kernel layout."""
    w1, b1, w2, b2, w3, b3, w4, b4, w5, b5, w6, b6 = natural
    d_in = state_dim + action_dim
    kp = _round_up(d_in, 8)

    # One packed layer-1 weight: rows = [x rows | u rows | zero pad rows],
    # cols = [head-1 padded | head-2 padded].
    w14 = jnp.concatenate(
        [_pad_to(w1, (d_in, H1P)), _pad_to(w4, (d_in, H1P))], axis=1)  # (d_in, 2*H1P)
    w14p = _pad_to(w14, (kp, 2 * H1P)).astype(jnp.bfloat16)
    b14 = jnp.concatenate([_pad_to(b1, (H1P,)), _pad_to(b4, (H1P,))])[None, :]

    w2p = _pad_to(w2, (H1P, H2P)).astype(jnp.bfloat16)
    w5p = _pad_to(w5, (H1P, H2P)).astype(jnp.bfloat16)
    b2p = _pad_to(b2, (H2P,))[None, :]
    b5p = _pad_to(b5, (H2P,))[None, :]

    w3r = _pad_to(w3[:, 0], (H2P,))[None, :]   # (1, H2P) f32, feeds the VPU
    w6r = _pad_to(w6[:, 0], (H2P,))[None, :]
    b36 = jnp.stack([b3[0], b6[0]])[None, :]   # (1, 2)

    return (w14p, b14, w2p, b2p, w5p, b5p, w3r, w6r, b36)


def reference_forward(x, u, natural):
    """Pure-JAX reference mirroring the kernel's bf16-weight / f32-accum math."""
    w1, b1, w2, b2, w3, b3, w4, b4, w5, b5, w6, b6 = natural
    xu = jnp.concatenate([x, u], axis=1).astype(jnp.float32)
    xub = xu.astype(jnp.bfloat16)

    def head(wa, ba, wb, bb, wc, bc):
        h = jnp.dot(xub, wa.astype(jnp.bfloat16),
                    preferred_element_type=jnp.float32) + ba
        h = _leaky_relu(h)
        h = jnp.dot(h.astype(jnp.bfloat16), wb.astype(jnp.bfloat16),
                    preferred_element_type=jnp.float32) + bb
        h = _leaky_relu(h)
        return jnp.dot(h, wc, preferred_element_type=jnp.float32) + bc

    return head(w1, b1, w2, b2, w3, b3), head(w4, b4, w5, b5, w6, b6)


if __name__ == "__main__":
    state_dim, action_dim, batch = 17, 6, 13   # batch exercises padding + 2 grid steps

    key = jax.random.PRNGKey(0)
    k_params, k_x, k_u = jax.random.split(key, 3)

    natural = init_natural_params(k_params, state_dim, action_dim)
    params = pack_params(natural, state_dim, action_dim)

    x = jax.random.normal(k_x, (batch, state_dim), jnp.float32)
    u = jax.random.normal(k_u, (batch, action_dim), jnp.float32)

    q1, q2 = critic_td3_forward(x, u, params)
    q1, q2 = jax.block_until_ready((q1, q2))

    r1, r2 = reference_forward(x, u, natural)
    assert q1.shape == (batch, 1) and q2.shape == (batch, 1)
    assert jnp.allclose(q1, r1, atol=2e-3, rtol=2e-3)
    assert jnp.allclose(q2, r2, atol=2e-3, rtol=2e-3)

    print("KERNEL_OK")
</pallas_src>

<mosaic_0001>
module attributes {stable_mosaic.version = 11 : i64} {
  func.func @critic_td3_kernel(%arg0: i32, %arg1: memref<8x17xf32, #tpu.memory_space<vmem>>, %arg2: memref<8x6xf32, #tpu.memory_space<vmem>>, %arg3: memref<24x1024xbf16, #tpu.memory_space<vmem>>, %arg4: memref<1x1024xf32, #tpu.memory_space<vmem>>, %arg5: memref<512x384xbf16, #tpu.memory_space<vmem>>, %arg6: memref<1x384xf32, #tpu.memory_space<vmem>>, %arg7: memref<512x384xbf16, #tpu.memory_space<vmem>>, %arg8: memref<1x384xf32, #tpu.memory_space<vmem>>, %arg9: memref<1x384xf32, #tpu.memory_space<vmem>>, %arg10: memref<1x384xf32, #tpu.memory_space<vmem>>, %arg11: memref<1x2xf32, #tpu.memory_space<vmem>>, %arg12: memref<8x2xf32, #tpu.memory_space<vmem>>) attributes {dimension_semantics = [#tpu.dimension_semantics<parallel>], iteration_bounds = array<i64: 2>, scalar_prefetch = 0 : i64, scratch_operands = 0 : i64, tpu.core_type = #tpu.core_type<tc>, window_params = [{transform_indices = @transform_0, window_bounds = array<i64: 8, 17>}, {transform_indices = @transform_1, window_bounds = array<i64: 8, 6>}, {pipeline_mode = #tpu.pipeline_mode<synchronous>, transform_indices = @transform_2, window_bounds = array<i64: 24, 1024>}, {pipeline_mode = #tpu.pipeline_mode<synchronous>, transform_indices = @transform_3, window_bounds = array<i64: 1, 1024>}, {pipeline_mode = #tpu.pipeline_mode<synchronous>, transform_indices = @transform_4, window_bounds = array<i64: 512, 384>}, {pipeline_mode = #tpu.pipeline_mode<synchronous>, transform_indices = @transform_5, window_bounds = array<i64: 1, 384>}, {pipeline_mode = #tpu.pipeline_mode<synchronous>, transform_indices = @transform_6, window_bounds = array<i64: 512, 384>}, {pipeline_mode = #tpu.pipeline_mode<synchronous>, transform_indices = @transform_7, window_bounds = array<i64: 1, 384>}, {pipeline_mode = #tpu.pipeline_mode<synchronous>, transform_indices = @transform_8, window_bounds = array<i64: 1, 384>}, {pipeline_mode = #tpu.pipeline_mode<synchronous>, transform_indices = @transform_9, window_bounds = array<i64: 1, 384>}, {pipeline_mode = #tpu.pipeline_mode<synchronous>, transform_indices = @transform_10, window_bounds = array<i64: 1, 2>}, {transform_indices = @transform_11, window_bounds = array<i64: 8, 2>}]} {
    %c0 = arith.constant 0 : index
    %c0_0 = arith.constant 0 : index
    %0 = vector.load %arg1[%c0, %c0_0] : memref<8x17xf32, #tpu.memory_space<vmem>>, vector<8x17xf32>
    %c0_1 = arith.constant 0 : index
    %c0_2 = arith.constant 0 : index
    %1 = vector.load %arg2[%c0_1, %c0_2] : memref<8x6xf32, #tpu.memory_space<vmem>>, vector<8x6xf32>
    %cst = arith.constant 0.000000e+00 : f32
    %2 = vector.broadcast %cst : f32 to vector<8x1xf32>
    %3 = tpu.concatenate %0, %1, %2 in 1 : vector<8x17xf32>, vector<8x6xf32>, vector<8x1xf32> -> vector<8x24xf32>
    %4 = arith.truncf %3 : vector<8x24xf32> to vector<8x24xbf16>
    %c0_3 = arith.constant 0 : index
    %c0_4 = arith.constant 0 : index
    %5 = vector.load %arg3[%c0_3, %c0_4] : memref<24x1024xbf16, #tpu.memory_space<vmem>>, vector<24x1024xbf16>
    %cst_5 = arith.constant dense<0.000000e+00> : vector<8x1024xf32>
    %6 = tpu.matmul %4, %5, %cst_5 {dimension_numbers = #tpu.dot_dimension_numbers<[1], [0], [0], [1], [0, 0, 1, 1], [], []>} : vector<8x24xbf16>, vector<24x1024xbf16>, vector<8x1024xf32> -> vector<8x1024xf32>
    %c0_6 = arith.constant 0 : index
    %c0_7 = arith.constant 0 : index
    %7 = vector.load %arg4[%c0_6, %c0_7] : memref<1x1024xf32, #tpu.memory_space<vmem>>, vector<1x1024xf32>
    %8 = vector.broadcast %7 : vector<1x1024xf32> to vector<8x1024xf32>
    %9 = arith.addf %6, %8 : vector<8x1024xf32>
    %cst_8 = arith.constant 0.00999999977 : f32
    %10 = vector.broadcast %cst_8 : f32 to vector<8x1024xf32>
    %11 = arith.mulf %10, %9 : vector<8x1024xf32>
    %12 = arith.maximumf %9, %11 : vector<8x1024xf32>
    %13 = vector.extract_strided_slice %12 {offsets = [0, 0], sizes = [8, 512], strides = [1, 1]} : vector<8x1024xf32> to vector<8x512xf32>
    %14 = arith.truncf %13 : vector<8x512xf32> to vector<8x512xbf16>
    %15 = vector.extract_strided_slice %12 {offsets = [0, 512], sizes = [8, 512], strides = [1, 1]} : vector<8x1024xf32> to vector<8x512xf32>
    %16 = arith.truncf %15 : vector<8x512xf32> to vector<8x512xbf16>
    %c0_9 = arith.constant 0 : index
    %c0_10 = arith.constant 0 : index
    %17 = vector.load %arg5[%c0_9, %c0_10] : memref<512x384xbf16, #tpu.memory_space<vmem>>, vector<512x384xbf16>
    %cst_11 = arith.constant dense<0.000000e+00> : vector<8x384xf32>
    %18 = tpu.matmul %14, %17, %cst_11 {dimension_numbers = #tpu.dot_dimension_numbers<[1], [0], [0], [1], [0, 0, 1, 1], [], []>} : vector<8x512xbf16>, vector<512x384xbf16>, vector<8x384xf32> -> vector<8x384xf32>
    %c0_12 = arith.constant 0 : index
    %c0_13 = arith.constant 0 : index
    %19 = vector.load %arg6[%c0_12, %c0_13] : memref<1x384xf32, #tpu.memory_space<vmem>>, vector<1x384xf32>
    %20 = vector.broadcast %19 : vector<1x384xf32> to vector<8x384xf32>
    %21 = arith.addf %18, %20 : vector<8x384xf32>
    %cst_14 = arith.constant 0.00999999977 : f32
    %22 = vector.broadcast %cst_14 : f32 to vector<8x384xf32>
    %23 = arith.mulf %22, %21 : vector<8x384xf32>
    %24 = arith.maximumf %21, %23 : vector<8x384xf32>
    %c0_15 = arith.constant 0 : index
    %c0_16 = arith.constant 0 : index
    %25 = vector.load %arg7[%c0_15, %c0_16] : memref<512x384xbf16, #tpu.memory_space<vmem>>, vector<512x384xbf16>
    %cst_17 = arith.constant dense<0.000000e+00> : vector<8x384xf32>
    %26 = tpu.matmul %16, %25, %cst_17 {dimension_numbers = #tpu.dot_dimension_numbers<[1], [0], [0], [1], [0, 0, 1, 1], [], []>} : vector<8x512xbf16>, vector<512x384xbf16>, vector<8x384xf32> -> vector<8x384xf32>
    %c0_18 = arith.constant 0 : index
    %c0_19 = arith.constant 0 : index
    %27 = vector.load %arg8[%c0_18, %c0_19] : memref<1x384xf32, #tpu.memory_space<vmem>>, vector<1x384xf32>
    %28 = vector.broadcast %27 : vector<1x384xf32> to vector<8x384xf32>
    %29 = arith.addf %26, %28 : vector<8x384xf32>
    %cst_20 = arith.constant 0.00999999977 : f32
    %30 = vector.broadcast %cst_20 : f32 to vector<8x384xf32>
    %31 = arith.mulf %30, %29 : vector<8x384xf32>
    %32 = arith.maximumf %29, %31 : vector<8x384xf32>
    %c0_21 = arith.constant 0 : index
    %c0_22 = arith.constant 0 : index
    %33 = vector.load %arg9[%c0_21, %c0_22] : memref<1x384xf32, #tpu.memory_space<vmem>>, vector<1x384xf32>
    %34 = vector.broadcast %33 : vector<1x384xf32> to vector<8x384xf32>
    %35 = arith.mulf %24, %34 : vector<8x384xf32>
    %cst_23 = arith.constant dense<0.000000e+00> : vector<8xf32>
    %36 = vector.multi_reduction <add>, %35, %cst_23 [1] : vector<8x384xf32> to vector<8xf32>
    %37 = vector.shape_cast %36 : vector<8xf32> to vector<8x1xf32>
    %c0_24 = arith.constant 0 : index
    %c0_25 = arith.constant 0 : index
    %38 = vector.load %arg10[%c0_24, %c0_25] : memref<1x384xf32, #tpu.memory_space<vmem>>, vector<1x384xf32>
    %39 = vector.broadcast %38 : vector<1x384xf32> to vector<8x384xf32>
    %40 = arith.mulf %32, %39 : vector<8x384xf32>
    %cst_26 = arith.constant dense<0.000000e+00> : vector<8xf32>
    %41 = vector.multi_reduction <add>, %40, %cst_26 [1] : vector<8x384xf32> to vector<8xf32>
    %42 = vector.shape_cast %41 : vector<8xf32> to vector<8x1xf32>
    %c0_27 = arith.constant 0 : index
    %c0_28 = arith.constant 0 : index
    %43 = vector.load %arg11[%c0_27, %c0_28] : memref<1x2xf32, #tpu.memory_space<vmem>>, vector<1x1xf32>
    %44 = vector.broadcast %43 : vector<1x1xf32> to vector<8x1xf32>
    %45 = arith.addf %37, %44 : vector<8x1xf32>
    %c0_29 = arith.constant 0 : index
    %c0_30 = arith.constant 0 : index
    %46 = vector.load %arg12[%c0_29, %c0_30] : memref<8x2xf32, #tpu.memory_space<vmem>>, vector<8x1xf32>
    tpu.vector_store %arg12[%c0_29, %c0_30], %45 {strides = array<i32>} : memref<8x2xf32, #tpu.memory_space<vmem>>, vector<8x1xf32>,
    %c0_31 = arith.constant 0 : index
    %c1 = arith.constant 1 : index
    %47 = vector.load %arg11[%c0_31, %c1] : memref<1x2xf32, #tpu.memory_space<vmem>>, vector<1x1xf32>
    %48 = vector.broadcast %47 : vector<1x1xf32> to vector<8x1xf32>
    %49 = arith.addf %42, %48 : vector<8x1xf32>
    %c0_32 = arith.constant 0 : index
    %c1_33 = arith.constant 1 : index
    %50 = vector.load %arg12[%c0_32, %c1_33] : memref<8x2xf32, #tpu.memory_space<vmem>>, vector<8x1xf32>
    tpu.vector_store %arg12[%c0_32, %c1_33], %49 {strides = array<i32>} : memref<8x2xf32, #tpu.memory_space<vmem>>, vector<8x1xf32>,
    return
  }
  func.func @transform_0(%arg0: i32) -> (i32, i32) {
    %c0_i32 = arith.constant 0 : i32
    %c0_i32_0 = arith.constant 0 : i32
    return %arg0, %c0_i32 : i32, i32
  }
  func.func @transform_1(%arg0: i32) -> (i32, i32) {
    %c0_i32 = arith.constant 0 : i32
    %c0_i32_0 = arith.constant 0 : i32
    return %arg0, %c0_i32 : i32, i32
  }
  func.func @transform_2(%arg0: i32) -> (i32, i32) {
    %c0_i32 = arith.constant 0 : i32
    %c0_i32_0 = arith.constant 0 : i32
    %c0_i32_1 = arith.constant 0 : i32
    return %c0_i32, %c0_i32_0 : i32, i32
  }
  func.func @transform_3(%arg0: i32) -> (i32, i32) {
    %c0_i32 = arith.constant 0 : i32
    %c0_i32_0 = arith.constant 0 : i32
    %c0_i32_1 = arith.constant 0 : i32
    return %c0_i32, %c0_i32_0 : i32, i32
  }
  func.func @transform_4(%arg0: i32) -> (i32, i32) {
    %c0_i32 = arith.constant 0 : i32
    %c0_i32_0 = arith.constant 0 : i32
    %c0_i32_1 = arith.constant 0 : i32
    return %c0_i32, %c0_i32_0 : i32, i32
  }
  func.func @transform_5(%arg0: i32) -> (i32, i32) {
    %c0_i32 = arith.constant 0 : i32
    %c0_i32_0 = arith.constant 0 : i32
    %c0_i32_1 = arith.constant 0 : i32
    return %c0_i32, %c0_i32_0 : i32, i32
  }
  func.func @transform_6(%arg0: i32) -> (i32, i32) {
    %c0_i32 = arith.constant 0 : i32
    %c0_i32_0 = arith.constant 0 : i32
    %c0_i32_1 = arith.constant 0 : i32
    return %c0_i32, %c0_i32_0 : i32, i32
  }
  func.func @transform_7(%arg0: i32) -> (i32, i32) {
    %c0_i32 = arith.constant 0 : i32
    %c0_i32_0 = arith.constant 0 : i32
    %c0_i32_1 = arith.constant 0 : i32
    return %c0_i32, %c0_i32_0 : i32, i32
  }
  func.func @transform_8(%arg0: i32) -> (i32, i32) {
    %c0_i32 = arith.constant 0 : i32
    %c0_i32_0 = arith.constant 0 : i32
    %c0_i32_1 = arith.constant 0 : i32
    return %c0_i32, %c0_i32_0 : i32, i32
  }
  func.func @transform_9(%arg0: i32) -> (i32, i32) {
    %c0_i32 = arith.constant 0 : i32
    %c0_i32_0 = arith.constant 0 : i32
    %c0_i32_1 = arith.constant 0 : i32
    return %c0_i32, %c0_i32_0 : i32, i32
  }
  func.func @transform_10(%arg0: i32) -> (i32, i32) {
    %c0_i32 = arith.constant 0 : i32
    %c0_i32_0 = arith.constant 0 : i32
    %c0_i32_1 = arith.constant 0 : i32
    return %c0_i32, %c0_i32_0 : i32, i32
  }
  func.func @transform_11(%arg0: i32) -> (i32, i32) {
    %c0_i32 = arith.constant 0 : i32
    %c0_i32_0 = arith.constant 0 : i32
    return %arg0, %c0_i32 : i32, i32
  }
}

</mosaic_0001>

<bundles_post_ra>
// kernel: critic_td3_forward.1
= control target key start
LH: loop header
LB: loop body
LE: loop exit
PB: predicated region body
PF: predicated region fallthrough
CT: control target
= control target key end

     0   :  { %16 = vsyncpa [#allocation3], 0  ;;  %s3587_s0 = inlined_call_operand.vmem [shape: f32[16,17], index: 0, kind: input, shape index: {}]   ;;  %s3588_s1 = inlined_call_operand.vmem [shape: f32[16,6], index: 1, kind: input, shape index: {}]   ;;  %s3589_s2 = inlined_call_operand.hbm [shape: bf16[24,1024], index: 2, kind: input, shape index: {}]   ;;  %s3590_s3 = inlined_call_operand.vmem [shape: f32[1,1024], index: 3, kind: input, shape index: {}]   ;;  %s3591_s4 = inlined_call_operand.hbm [shape: bf16[512,384], index: 4, kind: input, shape index: {}]   ;;  %s3592_s5 = inlined_call_operand.vmem [shape: f32[1,384], index: 5, kind: input, shape index: {}]   ;;  %s3593_s6 = inlined_call_operand.hbm [shape: bf16[512,384], index: 6, kind: input, shape index: {}]   ;;  %s3594_s7 = inlined_call_operand.vmem [shape: f32[1,384], index: 7, kind: input, shape index: {}]   ;;  %s3595_s8 = inlined_call_operand.vmem [shape: f32[1,384], index: 8, kind: input, shape index: {}]   ;;  %s3596_s9 = inlined_call_operand.vmem [shape: f32[1,384], index: 9, kind: input, shape index: {}]   ;;  %s3597_s10 = inlined_call_operand.vmem [shape: f32[1,2], index: 10, kind: input, shape index: {}]   ;;  %s3598_s11 = inlined_call_operand.vmem [shape: f32[16,2], index: 11, kind: output, shape index: {}]  }
   0x1   :  { %17 = vsyncpa [#allocation5], 0  ;;  %s3394_s17 = smov 0  }
   0x2 LB: > { %s3325_s18 = smov [#allocation4]   ;;  %s3400_s20 = sadd.s32 4294967295, %s3323_s17   ;;  %s3323_s17 = sphi %s3394_s17, %s23_s17  }
   0x3   : > { %s323_s19 = sshll.u32 %s3325_s18, 4  ;;  %p2602_p0 = scmp.ge.s32.totalorder %s3323_s17, 1  ;;  %s324_s19 = int_to_ptr.vmem [resolvable:$true] %s323_s19 }
   0x4   : > { %p295_p1 = scmp.lt.s32.totalorder %s3323_s17, 3  ;;  %p2944_p2 = scmp.eq.s32.totalorder %s3400_s20, 0 }
   0x5   : > { %s3326_s22 = smov [#allocation2]   ;;  %s3327_s25 = smov [#allocation6]  }
   0x6   : > { %p3405_p3 = pnand %p2602_p0, %p295_p1  ;;  %s307_s23 = sshll.u32 %s3326_s22, 4  ;;  %s3411_s23 = int_to_ptr.vmem [resolvable:$true] %s307_s23 }
   0x7   : > { %s3419_s26 = sshll.u32 %s3327_s25, 4  ;;  %s3242_s27 = scalar_lea.vmem %s324_s19, 12288  ;;  %s340_s26 = int_to_ptr.vmem [resolvable:$true] %s3419_s26 }
   0x8   : > { %p2934_p4 = pneg %p3405_p3  ;;  %p3243_p7 = scmp.ne.s32.totalorder %s324_s19, %s3242_s27 }
   0x9   : > { %p3250_p10 = scmp.lt.s32.totalorder %s324_s19, %s324_s19  ;;  %p3251_p11 = scmp.lt.s32.totalorder %s3242_s27, %s3242_s27 }
   0xa   : > { %p3415_p5 = pnand %p2944_p2, %p2934_p4 }
   0xb   : > { %p3252_p12 = por %p3251_p11, %p3250_p10 }
   0xc   : > { %p3233_p6 = pneg %p3415_p5 }
   0xe   : > { %p3245_p8 = pnand %p3243_p7, %p3233_p6 }
  0x10   : > { %p3246_p9 = pneg %p3245_p8 }
  0x12   : > { %p3253_p13 = pnand %p3252_p12, %p3246_p9 }
  0x14   : > { %3256 = shalt.err (!%p3253_p13)
}
  0x15   : > { %s3328_s28 = smov 192   ;;  %s3329_s29 = smov 12  }
  0x16   : > { %2940 = dma.hbm_to_vmem [thread:$0]  (!%p3415_p5), %s3591_s4, 12288, %s324_s19, [#allocation5], %s3328_s28, %s3328_s28, %s3329_s29  }
  0x17   : > { %s3268_s13 = scalar_lea.vmem %s3411_s23, 1536  ;;  %p3276_p7 = scmp.lt.s32.totalorder %s3411_s23, %s3411_s23 }
  0x18   : > { %p3269_p0 = scmp.ne.s32.totalorder %s3411_s23, %s3268_s13  ;;  %p3277_p8 = scmp.lt.s32.totalorder %s3268_s13, %s3268_s13 }
  0x1a   : > { %p3271_p1 = pnand %p3269_p0, %p3233_p6  ;;  %p3278_p9 = por %p3277_p8, %p3276_p7 }
  0x1c   : > { %p3272_p4 = pneg %p3271_p1 }
  0x1e   : > { %p3279_p10 = pnand %p3278_p9, %p3272_p4 }
  0x20   : > { %3282 = shalt.err (!%p3279_p10)
}
  0x21   : > { %s3330_s14 = smov 512   ;;  %s3331_s15 = smov 32  }
  0x22   : > { %2937 = dma.hbm_to_vmem [thread:$0]  (!%p3415_p5), %s3589_s2, 1536, %s3411_s23, [#allocation3], %s3330_s14, %s3330_s14, %s3331_s15  }
  0x23   : > { %s3294_s19 = scalar_lea.vmem %s340_s26, 12288  ;;  %p3302_p0 = scmp.lt.s32.totalorder %s340_s26, %s340_s26 }
  0x24   : > { %p3295_p11 = scmp.ne.s32.totalorder %s340_s26, %s3294_s19  ;;  %p3303_p1 = scmp.lt.s32.totalorder %s3294_s19, %s3294_s19 }
  0x26   : > { %p3297_p12 = pnand %p3295_p11, %p3233_p6  ;;  %p3304_p4 = por %p3303_p1, %p3302_p0 }
  0x28   : > { %p3298_p13 = pneg %p3297_p12 }
  0x2a   : > { %p3305_p7 = pnand %p3304_p4, %p3298_p13 }
  0x2c   : > { %3308 = shalt.err (!%p3305_p7)
}
  0x2d   : > { %2943 = dma.hbm_to_vmem [thread:$0]  (!%p3415_p5), %s3593_s6, 12288, %s340_s26, [#allocation5], %s3328_s28, %s3328_s28, %s3329_s29  }
  0x2e   : > { %381 = sbr.rel (%p3405_p3) target bundleno = 861 (0x35d), region = 64 }
  0x33   : > { %3314 = dma.done.wait (%p2944_p2), [#allocation3], 1536  }
  0x34   : > { %3316 = vsyncadd (%p2944_p2), [#allocation3], 4294965760 }
  0x35   : > { %3318 = dma.done.wait (%p2944_p2), [#allocation5], 24576  }
  0x36   : > { %3320 = vsyncadd (%p2944_p2), [#allocation5], 4294942720  ;;  %p431_p6 = scmp.lt.s32.totalorder %s3400_s20, 1  ;;  %v3332_v0 = vmov 0   ;;  %v463_v2 = vld [vmem:[#allocation2 + $0x40] sm:$0xff]  ;;  %vm573_vm0 = vcmask 1043456  }
  0x37   : > { %630 = vmatprep.mubr.bf16.mxu0 %v3332_v0  ;;  %671 = vmatprep.mubr.bf16.mxu1 %v3332_v0  ;;  %v464_v3 = vld [vmem:[#allocation2 + $0x48] sm:$0xff]  ;;  %s3333_s27 = smov 17   ;;  %v2623_v4 = vcombine.high %v463_v2, %v463_v2  ;;  %v2622_v6 = vcombine.low %v463_v2, %v463_v2  ;;  %v455_v8 = vld [vmem:[#allocation2] sm:$0xff]  ;;  %v465_v13 = vld [vmem:[#allocation2 + $0x50] sm:$0xff]  ;;  %vm450_vm1 = vcmask 138240   ;;  %vm452_vm2 = vcmask 187392  }
  0x38   : > { %s3602_s20 = smov (!%p431_p6, %s3400_s20), 1  ;;  %v2625_v5 = vcombine.high %v464_v3, %v464_v3  ;;  %v2624_v7 = vcombine.low %v464_v3, %v464_v3  ;;  %v459_v9 = vld [vmem:[#allocation2 + $0x20] sm:$0xff]  ;;  %v456_v11 = vld [vmem:[#allocation2 + $0x8] sm:$0xff]  ;;  %v466_v17 = vld [vmem:[#allocation2 + $0x58] sm:$0xff]  ;;  %v2626_v20 = vcombine.low %v465_v13, %v465_v13  ;;  %v2627_v21 = vcombine.high %v465_v13, %v465_v13 }
  0x39   : > { %s3467_s21 = sshll.u32 %s3602_s20, 3  ;;  %v2615_v10 = vcombine.high %v455_v8, %v459_v9  ;;  %v460_v12 = vld [vmem:[#allocation2 + $0x28] sm:$0xff]  ;;  %2630 = vmatprep.subr.msk.bf16.mxu0 %vm573_vm0, %v2623_v4  ;;  %v575_v14 = vsel %vm573_vm0, %v2622_v6, 0  ;;  %v2614_v18 = vcombine.low %v455_v8, %v459_v9  ;;  %v2629_v22 = vcombine.high %v466_v17, %v466_v17  ;;  %v457_v27 = vld [vmem:[#allocation2 + $0x10] sm:$0xff]  ;;  %v458_v30 = vld [vmem:[#allocation2 + $0x18] sm:$0xff] }
  0x3a   : > { %s438_s26 = scalar_lea.vmem %s3588_s1, %s3467_s21  ;;  %2632 = vmatprep.subr.msk.bf16.mxu1 %vm573_vm0, %v2625_v5  ;;  %v581_v15 = vsel %vm573_vm0, %v2624_v7, 0  ;;  %v2617_v16 = vcombine.high %v456_v11, %v460_v12  ;;  %611 = vmatpush1.bf16.msra.mxu0 %v575_v14  ;;  %v2616_v19 = vcombine.low %v456_v11, %v460_v12  ;;  %v2628_v23 = vcombine.low %v466_v17, %v466_v17  ;;  %s434_s29 = scalar_lea.vmem %s3587_s0, %s3467_s21  ;;  %v461_v29 = vld [vmem:[#allocation2 + $0x30] sm:$0xff]  ;;  %v462_v31 = vld [vmem:[#allocation2 + $0x38] sm:$0xff]  ;;  %v2993_v53 = vld [vmem:[#allocation4 + $0x60] ss:$12 sps:$4 sm:$0xff]  }
  0x3b   : > { %v445_v1 = vld [vmem:[%s438_s26] sm:$0xff]  ;;  %652 = vmatpush1.bf16.msra.mxu1 %v581_v15  ;;  %612 = vmatprep.subr.bf16.mxu0 %v2615_v10  ;;  %v587_v24 = vsel %vm573_vm0, %v2626_v20, 0  ;;  %vm569_vm3 = vcmask 195584   ;;  %v2619_v35 = vcombine.high %v457_v27, %v461_v29  ;;  %v2621_v36 = vcombine.high %v458_v30, %v462_v31  ;;  %v2977_v39 = vld [vmem:[#allocation4 + $0xac] ss:$12 sps:$4 sm:$0xff]   ;;  %s442_s20 = scalar_lea.vmem %s3598_s11, %s3467_s21 }
  0x3c   : > { %447 = vrot.lane.b32.xlu0 %v445_v1, %s3333_s27  ;;  %653 = vmatprep.subr.bf16.mxu1 %v2617_v16  ;;  %v593_v25 = vsel %vm573_vm0, %v2628_v23, 0  ;;  %v444_v26 = vld [vmem:[%s434_s29] sm:$0xff]  ;;  %v2618_v37 = vcombine.low %v457_v27, %v461_v29  ;;  %v2620_v38 = vcombine.low %v458_v30, %v462_v31  ;;  %v2980_v40 = vld [vmem:[#allocation4 + $0x22c] ss:$12 sps:$4 sm:$0xff]   ;;  %v2975_v41 = vld [vmem:[#allocation4 + $0xa8] ss:$12 sps:$4 sm:$0xff]  }
  0x3d   : > { %v2978_v42 = vld [vmem:[#allocation4 + $0x228] ss:$12 sps:$4 sm:$0xff]   ;;  %v2981_v45 = vld [vmem:[#allocation4 + $0x90] ss:$12 sps:$4 sm:$0xff]   ;;  %v2987_v49 = vld [vmem:[#allocation4 + $0x78] ss:$12 sps:$4 sm:$0xff]  }
  0x3e   : > { %613 = vmatpush1.bf16.msra.mxu0 %v2614_v18  ;;  %v2983_v43 = vld [vmem:[#allocation4 + $0x94] ss:$12 sps:$4 sm:$0xff]   ;;  %v2984_v46 = vld [vmem:[#allocation4 + $0x210] ss:$12 sps:$4 sm:$0xff]   ;;  %v2990_v50 = vld [vmem:[#allocation4 + $0x1f8] ss:$12 sps:$4 sm:$0xff]  }
  0x3f   : > { %654 = vmatpush1.bf16.msra.mxu1 %v2616_v19  ;;  %2634 = vmatprep.subr.msk.bf16.mxu0 %vm573_vm0, %v2627_v21  ;;  %v2986_v44 = vld [vmem:[#allocation4 + $0x214] ss:$12 sps:$4 sm:$0xff]   ;;  %v2989_v47 = vld [vmem:[#allocation4 + $0x7c] ss:$12 sps:$4 sm:$0xff]   ;;  %v2995_v51 = vld [vmem:[#allocation4 + $0x64] ss:$12 sps:$4 sm:$0xff]  }
  0x40   : > { %2636 = vmatprep.subr.msk.bf16.mxu1 %vm573_vm0, %v2629_v22  ;;  %v2992_v48 = vld [vmem:[#allocation4 + $0x1fc] ss:$12 sps:$4 sm:$0xff]   ;;  %v2998_v52 = vld [vmem:[#allocation4 + $0x1e4] ss:$12 sps:$4 sm:$0xff]   ;;  %v2996_v54 = vld [vmem:[#allocation4 + $0x1e0] ss:$12 sps:$4 sm:$0xff]  }
  0x41   : > { %v3001_v55 = vld [vmem:[#allocation4 + $0x4c] ss:$12 sps:$4 sm:$0xff]   ;;  %v2999_v57 = vld [vmem:[#allocation4 + $0x48] ss:$12 sps:$4 sm:$0xff]   ;;  %v3005_v61 = vld [vmem:[#allocation4 + $0x30] ss:$12 sps:$4 sm:$0xff]  }
  0x42   : > { %v3004_v56 = vld [vmem:[#allocation4 + $0x1cc] ss:$12 sps:$4 sm:$0xff]   ;;  %v3002_v58 = vld [vmem:[#allocation4 + $0x1c8] ss:$12 sps:$4 sm:$0xff]   ;;  %v3008_v62 = vld [vmem:[#allocation4 + $0x1b0] ss:$12 sps:$4 sm:$0xff]  }
  0x43   : > { %v3007_v59 = vld [vmem:[#allocation4 + $0x34] ss:$12 sps:$4 sm:$0xff]   ;;  %v3013_v63 = vld [vmem:[#allocation4 + $0x1c] ss:$12 sps:$4 sm:$0xff]   ;;  %v3011_v1 = vld [vmem:[#allocation4 + $0x18] ss:$12 sps:$4 sm:$0xff]  }
  0x44   : > { %v3010_v60 = vld [vmem:[#allocation4 + $0x1b4] ss:$12 sps:$4 sm:$0xff]   ;;  %v3014_v2 = vld [vmem:[#allocation4 + $0x198] ss:$12 sps:$4 sm:$0xff]   ;;  %v3029_v13 = vld [vmem:[#allocation4 + $0x150] ss:$12 sps:$4 sm:$0xff]  }
  0x45   : > { %v3019_v3 = vld [vmem:[#allocation4 + $0x4] ss:$12 sps:$4 sm:$0xff]   ;;  %v3017_v5 = vld [vmem:[#allocation4] ss:$12 sps:$4 sm:$0xff]   ;;  %v3023_v9 = vld [vmem:[#allocation4 + $0x168] ss:$12 sps:$4 sm:$0xff]  }
  0x46   : > { %v3022_v4 = vld [vmem:[#allocation4 + $0x184] ss:$12 sps:$4 sm:$0xff]   ;;  %v3020_v6 = vld [vmem:[#allocation4 + $0x180] ss:$12 sps:$4 sm:$0xff]   ;;  %v3026_v10 = vld [vmem:[#allocation4 + $0x2e8] ss:$12 sps:$4 sm:$0xff]  }
  0x47   : > { %v3025_v7 = vld [vmem:[#allocation4 + $0x16c] ss:$12 sps:$4 sm:$0xff]   ;;  %v3031_v11 = vld [vmem:[#allocation4 + $0x154] ss:$12 sps:$4 sm:$0xff]   ;;  %v3032_v14 = vld [vmem:[#allocation4 + $0x2d0] ss:$12 sps:$4 sm:$0xff]  }
  0x48   : > { %v3028_v8 = vld [vmem:[#allocation4 + $0x2ec] ss:$12 sps:$4 sm:$0xff]   ;;  %v3034_v12 = vld [vmem:[#allocation4 + $0x2d4] ss:$12 sps:$4 sm:$0xff]   ;;  %v3037_v15 = vld [vmem:[#allocation4 + $0x13c] ss:$12 sps:$4 sm:$0xff]  }
  0x49   : > { %v3040_v16 = vld [vmem:[#allocation4 + $0x2bc] ss:$12 sps:$4 sm:$0xff]   ;;  %v3035_v17 = vld [vmem:[#allocation4 + $0x138] ss:$12 sps:$4 sm:$0xff]   ;;  %v3041_v21 = vld [vmem:[#allocation4 + $0x120] ss:$12 sps:$4 sm:$0xff]  }
  0x4a   : > { %v3038_v18 = vld [vmem:[#allocation4 + $0x2b8] ss:$12 sps:$4 sm:$0xff]   ;;  %v3044_v22 = vld [vmem:[#allocation4 + $0x2a0] ss:$12 sps:$4 sm:$0xff]   ;;  %v3053_v29 = vld [vmem:[#allocation4 + $0xf0] ss:$12 sps:$4 sm:$0xff]  }
  0x4b   : > { %v3043_v19 = vld [vmem:[#allocation4 + $0x124] ss:$12 sps:$4 sm:$0xff]   ;;  %v3049_v23 = vld [vmem:[#allocation4 + $0x10c] ss:$12 sps:$4 sm:$0xff]   ;;  %v3055_v27 = vld [vmem:[#allocation4 + $0xf4] ss:$12 sps:$4 sm:$0xff]  }
  0x4c   : > { %v3046_v20 = vld [vmem:[#allocation4 + $0x2a4] ss:$12 sps:$4 sm:$0xff]   ;;  %v3061_v31 = vld [vmem:[#allocation4 + $0xdc] ss:$12 sps:$4 sm:$0xff]   ;;  %vm2492_vm4 = vcmask 7168   ;;  %vm2502_vm5 = vcmask 15368  }
  0x4d   : > { %v3056_v30 = vld [vmem:[#allocation4 + $0x270] ss:$12 sps:$4 sm:$0xff]  }
  0xae   : > { %v448_v28 = vpop.permute.xlu0 %447 }
  0xaf   : > { %v451_v32 = vsel %vm450_vm1, %v444_v26, %v448_v28  ;;  %v3050_v26 = vld [vmem:[#allocation4 + $0x288] ss:$12 sps:$4 sm:$0xff]  }
  0xb0   : > { %v453_v33 = vsel %vm452_vm2, %v451_v32, 0.0  ;;  %v3058_v28 = vld [vmem:[#allocation4 + $0x274] ss:$12 sps:$4 sm:$0xff]   ;;  %v3064_v32 = vld [vmem:[#allocation4 + $0x25c] ss:$12 sps:$4 sm:$0xff]  }
  0xb1   : > { %v454_v34 = vpack.c.bf16 %v453_v33, %v453_v33  ;;  %v3059_v33 = vld [vmem:[#allocation4 + $0xd8] ss:$12 sps:$4 sm:$0xff]  }
  0xb3   : > { %2631 = vmatmul.mubr.msk.bf16.vlgmr.msra.gmra.mxu0 %vm569_vm3, %v454_v34  ;;  %2633 = vmatmul.mubr.msk.bf16.vlgmr.msra.gmra.mxu1 %vm569_vm3, %v454_v34 }
  0xb4   : > { %693 = vmatpush1.bf16.msra.mxu0 %v587_v24  ;;  %734 = vmatpush1.bf16.msra.mxu1 %v593_v25  ;;  %v3052_v24 = vld [vmem:[#allocation4 + $0x28c] ss:$12 sps:$4 sm:$0xff]   ;;  %v3047_v25 = vld [vmem:[#allocation4 + $0x108] ss:$12 sps:$4 sm:$0xff]  }
  0xb5   : > { %694 = vmatprep.subr.bf16.mxu0 %v2619_v35  ;;  %735 = vmatprep.subr.bf16.mxu1 %v2621_v36  ;;  %v3067_v35 = vld [vmem:[#allocation4 + $0xc4] ss:$12 sps:$4 sm:$0xff]  }
  0xb6   : > { %712 = vmatprep.mubr.bf16.mxu0 %v3332_v0  ;;  %753 = vmatprep.mubr.bf16.mxu1 %v3332_v0  ;;  %v3016_v0 = vld [vmem:[#allocation4 + $0x19c] ss:$12 sps:$4 sm:$0xff]   ;;  %v3070_v36 = vld [vmem:[#allocation4 + $0x244] ss:$12 sps:$4 sm:$0xff]  }
  0xb8   : > { %695 = vmatpush1.bf16.msra.mxu0 %v2618_v37  ;;  %736 = vmatpush1.bf16.msra.mxu1 %v2620_v38  ;;  %v3065_v37 = vld [vmem:[#allocation4 + $0xc0] ss:$12 sps:$4 sm:$0xff]  }
  0xb9   : > { %1443 = vmatprep.subr.bf16.mxu0 %v2977_v39  ;;  %1484 = vmatprep.subr.bf16.mxu1 %v2980_v40  ;;  %v3068_v38 = vld [vmem:[#allocation4 + $0x240] ss:$12 sps:$4 sm:$0xff]   ;;  %v3071_v39 = vld [vmem:[#allocation4 + $0x170] ss:$12 sps:$4 sm:$0xff]  }
  0xba   : > { %v3072_v40 = vld [vmem:[#allocation4 + $0x2f0] ss:$12 sps:$4 sm:$0xff]  }
  0xbb   : > { %2635 = vmatmul.mubr.msk.bf16.vlgmr.msra.gmra.mxu0 %vm569_vm3, %v454_v34  ;;  %2637 = vmatmul.mubr.msk.bf16.vlgmr.msra.gmra.mxu1 %vm569_vm3, %v454_v34  ;;  %v3062_v34 = vld [vmem:[#allocation4 + $0x258] ss:$12 sps:$4 sm:$0xff]  }
  0xbc   : > { %1444 = vmatpush1.bf16.msra.mxu0 %v2975_v41  ;;  %1485 = vmatpush1.bf16.msra.mxu1 %v2978_v42  ;;  %v469_v41 = vlaneseq }
  0xbd   : > { %1445 = vmatprep.subr.bf16.mxu0 %v2983_v43  ;;  %1486 = vmatprep.subr.bf16.mxu1 %v2986_v44 }
  0xbe   : > { %v3491_v42 = vshrl.u32 %v469_v41, 7  ;;  %v3092_v41 = vld [vmem:[#allocation4 + $0x278] ss:$12 sps:$4 sm:$0xff]  }
  0xc0   : > { %1446 = vmatpush1.bf16.msra.mxu0 %v2981_v45  ;;  %1487 = vmatpush1.bf16.msra.mxu1 %v2984_v46  ;;  %v3494_v43 = vsub.s32 0, %v3491_v42  ;;  %v3497_v44 = vsub.s32 2, %v3491_v42  ;;  %v3502_v45 = vld [vmem:[%s3590_s3] sm:$0xff]  ;;  %v3505_v46 = vsub.s32 1, %v3491_v42 }
  0xc1   : > { %1447 = vmatprep.subr.bf16.mxu0 %v2989_v47  ;;  %1488 = vmatprep.subr.bf16.mxu1 %v2992_v48  ;;  %v483_v47 = vsub.s32 3, %v3491_v42 }
  0xc2   : > { %v472_v48 = vrot.slane %v3502_v45, %v3494_v43 }
  0xc4   : > { %1448 = vmatpush1.bf16.msra.mxu0 %v2987_v49  ;;  %1489 = vmatpush1.bf16.msra.mxu1 %v2990_v50  ;;  %v480_v49 = vrot.slane %v3502_v45, %v3497_v44  ;;  %v476_v50 = vrot.slane %v3502_v45, %v3505_v46 }
  0xc5   : > { %1449 = vmatprep.subr.bf16.mxu0 %v2995_v51  ;;  %1490 = vmatprep.subr.bf16.mxu1 %v2998_v52  ;;  %v484_v51 = vrot.slane %v3502_v45, %v483_v47 }
  0xc8   : > { %1450 = vmatpush1.bf16.msra.mxu0 %v2993_v53  ;;  %1491 = vmatpush1.bf16.msra.mxu1 %v2996_v54 }
  0xc9   : > { %1451 = vmatprep.subr.bf16.mxu0 %v3001_v55  ;;  %1492 = vmatprep.subr.bf16.mxu1 %v3004_v56 }
  0xcc   : > { %1452 = vmatpush1.bf16.msra.mxu0 %v2999_v57  ;;  %1493 = vmatpush1.bf16.msra.mxu1 %v3002_v58 }
  0xcd   : > { %1453 = vmatprep.subr.bf16.mxu0 %v3007_v59  ;;  %1494 = vmatprep.subr.bf16.mxu1 %v3010_v60 }
  0xd0   : > { %1454 = vmatpush1.bf16.msra.mxu0 %v3005_v61  ;;  %1495 = vmatpush1.bf16.msra.mxu1 %v3008_v62 }
  0xd1   : > { %1455 = vmatprep.subr.bf16.mxu0 %v3013_v63  ;;  %1496 = vmatprep.subr.bf16.mxu1 %v3016_v0 }
  0xd4   : > { %1456 = vmatpush1.bf16.msra.mxu0 %v3011_v1  ;;  %1497 = vmatpush1.bf16.msra.mxu1 %v3014_v2 }
  0xd5   : > { %1457 = vmatprep.subr.bf16.mxu0 %v3019_v3  ;;  %1498 = vmatprep.subr.bf16.mxu1 %v3022_v4 }
  0xd8   : > { %1458 = vmatpush1.bf16.msra.mxu0 %v3017_v5  ;;  %1499 = vmatpush1.bf16.msra.mxu1 %v3020_v6 }
  0xd9   : > { %1459 = vmatprep.subr.bf16.mxu0 %v3025_v7  ;;  %1500 = vmatprep.subr.bf16.mxu1 %v3028_v8 }
  0xdc   : > { %1460 = vmatpush2.bf16.msra.mxu0 %v3023_v9  ;;  %1501 = vmatpush2.bf16.msra.mxu1 %v3026_v10 }
  0xdd   : > { %1461 = vmatprep.subr.bf16.mxu0 %v3031_v11  ;;  %1502 = vmatprep.subr.bf16.mxu1 %v3034_v12  ;;  %v3073_v12 = vld [vmem:[#allocation4 + $0xb0] ss:$12 sps:$4 sm:$0xff]  }
  0xe0   : > { %1462 = vmatpush2.bf16.msra.mxu0 %v3029_v13  ;;  %1503 = vmatpush2.bf16.msra.mxu1 %v3032_v14  ;;  %v3074_v13 = vld [vmem:[#allocation4 + $0x230] ss:$12 sps:$4 sm:$0xff]  }
  0xe1   : > { %1463 = vmatprep.subr.bf16.mxu0 %v3037_v15  ;;  %1504 = vmatprep.subr.bf16.mxu1 %v3040_v16 }
  0xe4   : > { %1464 = vmatpush2.bf16.msra.mxu0 %v3035_v17  ;;  %1505 = vmatpush2.bf16.msra.mxu1 %v3038_v18  ;;  %v3075_v18 = vld [vmem:[#allocation4 + $0x158] ss:$12 sps:$4 sm:$0xff]  }
  0xe5   : > { %1465 = vmatprep.subr.bf16.mxu0 %v3043_v19  ;;  %1506 = vmatprep.subr.bf16.mxu1 %v3046_v20 }
  0xe8   : > { %1466 = vmatpush2.bf16.msra.mxu0 %v3041_v21  ;;  %1507 = vmatpush2.bf16.msra.mxu1 %v3044_v22  ;;  %v3076_v21 = vld [vmem:[#allocation4 + $0x2d8] ss:$12 sps:$4 sm:$0xff]  }
  0xe9   : > { %1467 = vmatprep.subr.bf16.mxu0 %v3049_v23  ;;  %1508 = vmatprep.subr.bf16.mxu1 %v3052_v24  ;;  %v3077_v22 = vld [vmem:[#allocation4 + $0x98] ss:$12 sps:$4 sm:$0xff]  }
  0xea   : > { %v3078_v23 = vld [vmem:[#allocation4 + $0x218] ss:$12 sps:$4 sm:$0xff]  }
  0xec   : > { %1468 = vmatpush2.bf16.msra.mxu0 %v3047_v25  ;;  %1509 = vmatpush2.bf16.msra.mxu1 %v3050_v26  ;;  %v3079_v26 = vld [vmem:[#allocation4 + $0x140] ss:$12 sps:$4 sm:$0xff]  }
  0xed   : > { %1469 = vmatprep.subr.bf16.mxu0 %v3055_v27  ;;  %1510 = vmatprep.subr.bf16.mxu1 %v3058_v28  ;;  %v3080_v27 = vld [vmem:[#allocation4 + $0x2c0] ss:$12 sps:$4 sm:$0xff]  }
  0xee   : > { %v3081_v28 = vld [vmem:[#allocation4 + $0x80] ss:$12 sps:$4 sm:$0xff]  }
  0xf0   : > { %1470 = vmatpush2.bf16.msra.mxu0 %v3053_v29  ;;  %1511 = vmatpush2.bf16.msra.mxu1 %v3056_v30  ;;  %v3082_v29 = vld [vmem:[#allocation4 + $0x200] ss:$12 sps:$4 sm:$0xff]   ;;  %v3083_v30 = vld [vmem:[#allocation4 + $0x128] ss:$12 sps:$4 sm:$0xff]  }
  0xf1   : > { %1471 = vmatprep.subr.bf16.mxu0 %v3061_v31  ;;  %1512 = vmatprep.subr.bf16.mxu1 %v3064_v32  ;;  %v3084_v31 = vld [vmem:[#allocation4 + $0x2a8] ss:$12 sps:$4 sm:$0xff]  }
  0xf2   : > { %v3085_v32 = vld [vmem:[#allocation4 + $0x68] ss:$12 sps:$4 sm:$0xff]  }
  0xf4   : > { %1472 = vmatpush2.bf16.msra.mxu0 %v3059_v33  ;;  %1513 = vmatpush2.bf16.msra.mxu1 %v3062_v34  ;;  %v3086_v33 = vld [vmem:[#allocation4 + $0x1e8] ss:$12 sps:$4 sm:$0xff]   ;;  %v3087_v34 = vld [vmem:[#allocation4 + $0x110] ss:$12 sps:$4 sm:$0xff]  }
  0xf5   : > { %1473 = vmatprep.subr.bf16.mxu0 %v3067_v35  ;;  %1514 = vmatprep.subr.bf16.mxu1 %v3070_v36  ;;  %v3088_v35 = vld [vmem:[#allocation4 + $0x290] ss:$12 sps:$4 sm:$0xff]   ;;  %v491_v36 = vsub.s32 5, %v3491_v42 }
  0xf7   : > { %v492_v47 = vrot.slane %v3502_v45, %v491_v36  ;;  %v3148_v36 = vld [vmem:[#allocation6 + $0x180] ss:$12 sps:$4 sm:$0xff]  }
  0xf8   : > { %1474 = vmatpush2.bf16.msra.mxu0 %v3065_v37  ;;  %1515 = vmatpush2.bf16.msra.mxu1 %v3068_v38  ;;  %v499_v37 = vsub.s32 7, %v3491_v42  ;;  %v3089_v38 = vld [vmem:[#allocation4 + $0x50] ss:$12 sps:$4 sm:$0xff]  }
  0xf9   : > { %2834 = vmatprep.subr.bf16.mxu0 %v3071_v39  ;;  %2856 = vmatprep.subr.bf16.mxu1 %v3072_v40  ;;  %v3090_v39 = vld [vmem:[#allocation4 + $0x1d0] ss:$12 sps:$4 sm:$0xff]   ;;  %v3091_v40 = vld [vmem:[#allocation4 + $0xf8] ss:$12 sps:$4 sm:$0xff]  }
 0x173   : > { %v632_v52 = vpop.f32.mrf.mxu0  ;;  %v673_v53 = vpop.f32.mrf.mxu1 }
 0x174   : > { %v633_v54 = vadd.f32 %v632_v52, %v472_v48  ;;  %v674_v55 = vadd.f32 %v673_v53, %v480_v49  ;;  %v500_v48 = vrot.slane %v3502_v45, %v499_v37  ;;  %v3093_v49 = vld [vmem:[#allocation4 + $0x38] ss:$12 sps:$4 sm:$0xff]   ;;  %v3096_v52 = vld [vmem:[#allocation4 + $0x260] ss:$12 sps:$4 sm:$0xff]  }
 0x175   : > { %v634_v56 = vpop.f32.mrf.mxu0  ;;  %v675_v57 = vpop.f32.mrf.mxu1  ;;  %v3153_v37 = vld [vmem:[#allocation6 + $0x16c] ss:$12 sps:$4 sm:$0xff]  }
 0x176   : > { %v762_v58 = vmul.f32 0.01, %v633_v54  ;;  %v764_v59 = vmul.f32 0.01, %v674_v55  ;;  %v635_v60 = vadd.f32 %v634_v56, %v476_v50  ;;  %v676_v61 = vadd.f32 %v675_v57, %v484_v51  ;;  %v3094_v50 = vld [vmem:[#allocation4 + $0x1b8] ss:$12 sps:$4 sm:$0xff]  }
 0x177   : > { %v636_v62 = vpop.f32.mrf.mxu0  ;;  %v677_v63 = vpop.f32.mrf.mxu1  ;;  %v3095_v51 = vld [vmem:[#allocation4 + $0xe0] ss:$12 sps:$4 sm:$0xff]   ;;  %v3099_v57 = vld [vmem:[#allocation4 + $0xc8] ss:$12 sps:$4 sm:$0xff]  }
 0x178   : > { %v763_v0 = vmul.f32 0.01, %v635_v60  ;;  %v765_v1 = vmul.f32 0.01, %v676_v61  ;;  %v770_v2 = vmax.f32 %v633_v54, %v762_v58  ;;  %v772_v3 = vmax.f32 %v674_v55, %v764_v59  ;;  %v3097_v55 = vld [vmem:[#allocation4 + $0x20] ss:$12 sps:$4 sm:$0xff]  }
 0x179   : > { %v637_v4 = vpop.f32.mrf.mxu0  ;;  %v678_v5 = vpop.f32.mrf.mxu1  ;;  %v3098_v56 = vld [vmem:[#allocation4 + $0x1a0] ss:$12 sps:$4 sm:$0xff]   ;;  %v3100_v58 = vld [vmem:[#allocation4 + $0x248] ss:$12 sps:$4 sm:$0xff]  }
 0x17a   : > { %v771_v6 = vmax.f32 %v635_v60, %v763_v0  ;;  %v773_v7 = vmax.f32 %v676_v61, %v765_v1  ;;  %v3519_v14 = vpack.c.bf16 %v770_v2, %v770_v2  ;;  %v3521_v15 = vpack.c.bf16 %v772_v3, %v772_v3  ;;  %v3101_v61 = vld [vmem:[#allocation4 + $0x8] ss:$12 sps:$4 sm:$0xff]   ;;  %v3105_v63 = vld [vmem:[#allocation6 + $0xac] ss:$12 sps:$4 sm:$0xff]  }
 0x17b   : > { %v3515_v8 = vpop.f32.mrf.mxu0  ;;  %v3517_v9 = vpop.f32.mrf.mxu1  ;;  %v3102_v62 = vld [vmem:[#allocation4 + $0x188] ss:$12 sps:$4 sm:$0xff]   ;;  %v3108_v0 = vld [vmem:[#allocation6 + $0x22c] ss:$12 sps:$4 sm:$0xff]  }
 0x17c   : > { %v779_v10 = vpack.c.bf16 %v771_v6, %v771_v6  ;;  %v781_v11 = vpack.c.bf16 %v773_v7, %v773_v7  ;;  %v3103_v3 = vld [vmem:[#allocation6 + $0xa8] ss:$12 sps:$4 sm:$0xff]  }
 0x17d   : > { %v716_v16 = vpop.f32.mrf.mxu0  ;;  %v757_v17 = vpop.f32.mrf.mxu1  ;;  %v3106_v4 = vld [vmem:[#allocation6 + $0x228] ss:$12 sps:$4 sm:$0xff]  }
 0x17e   : > { %1475 = vmatprep.mubr.bf16.mxu0 %v779_v10  ;;  %1516 = vmatprep.mubr.bf16.mxu1 %v781_v11  ;;  %v717_v53 = vadd.f32 %v716_v16, %v492_v47  ;;  %v758_v54 = vadd.f32 %v757_v17, %v500_v48  ;;  %v3111_v6 = vld [vmem:[#allocation6 + $0x94] ss:$12 sps:$4 sm:$0xff]   ;;  %v3120_v16 = vld [vmem:[#allocation6 + $0x1fc] ss:$12 sps:$4 sm:$0xff]   ;;  %v3115_v17 = vld [vmem:[#allocation6 + $0x78] ss:$12 sps:$4 sm:$0xff]  }
 0x17f   : > { %v718_v19 = vpop.f32.mrf.mxu0  ;;  %v759_v20 = vpop.f32.mrf.mxu1  ;;  %1476 = vmatmul.mubr.bf16.vlgmr.msra.gmra.mxu0 %v3519_v14  ;;  %1517 = vmatmul.mubr.bf16.vlgmr.msra.gmra.mxu1 %v3521_v15  ;;  %v3114_v7 = vld [vmem:[#allocation6 + $0x214] ss:$12 sps:$4 sm:$0xff]   ;;  %v3157_v48 = vld [vmem:[#allocation6 + $0x150] ss:$12 sps:$4 sm:$0xff]  }
 0x180   : > { %2835 = vmatpush3.bf16.msra.mxu0 %v3073_v12  ;;  %2857 = vmatpush3.bf16.msra.mxu1 %v3074_v13  ;;  %v767_v59 = vmul.f32 0.01, %v717_v53  ;;  %v769_v60 = vmul.f32 0.01, %v758_v54  ;;  %v3112_v12 = vld [vmem:[#allocation6 + $0x210] ss:$12 sps:$4 sm:$0xff]  }
 0x181   : > { %1557 = vmatprep.mubr.bf16.mxu0 %v779_v10  ;;  %1597 = vmatprep.mubr.bf16.mxu1 %v781_v11  ;;  %v719_v24 = vpop.f32.mrf.mxu0  ;;  %v760_v25 = vpop.f32.mrf.mxu1  ;;  %v3109_v11 = vld [vmem:[#allocation6 + $0x90] ss:$12 sps:$4 sm:$0xff]   ;;  %v3121_v19 = vld [vmem:[#allocation6 + $0x60] ss:$12 sps:$4 sm:$0xff]  }
 0x182   : > { %2836 = vmatprep.subr.bf16.mxu0 %v3075_v18  ;;  %2858 = vmatprep.subr.bf16.mxu1 %v3076_v21  ;;  %v775_v1 = vmax.f32 %v717_v53, %v767_v59  ;;  %v777_v2 = vmax.f32 %v758_v54, %v769_v60  ;;  %v3117_v13 = vld [vmem:[#allocation6 + $0x7c] ss:$12 sps:$4 sm:$0xff]   ;;  %v3118_v18 = vld [vmem:[#allocation6 + $0x1f8] ss:$12 sps:$4 sm:$0xff]   ;;  %v3124_v20 = vld [vmem:[#allocation6 + $0x1e0] ss:$12 sps:$4 sm:$0xff]  }
 0x183   : > { %v3129_v21 = vld [vmem:[#allocation6 + $0x4c] ss:$12 sps:$4 sm:$0xff]   ;;  %v3130_v24 = vld [vmem:[#allocation6 + $0x1c8] ss:$12 sps:$4 sm:$0xff]   ;;  %v3171_v54 = vld [vmem:[#allocation6 + $0x124] ss:$12 sps:$4 sm:$0xff]  }
 0x184   : > { %2837 = vmatpush3.bf16.msra.mxu0 %v3077_v22  ;;  %2859 = vmatpush3.bf16.msra.mxu1 %v3078_v23  ;;  %v3529_v5 = vpack.c.bf16 %v775_v1, %v775_v1  ;;  %v3531_v10 = vpack.c.bf16 %v777_v2, %v777_v2  ;;  %v3132_v22 = vld [vmem:[#allocation6 + $0x1cc] ss:$12 sps:$4 sm:$0xff]   ;;  %v3127_v23 = vld [vmem:[#allocation6 + $0x48] ss:$12 sps:$4 sm:$0xff]   ;;  %v495_v60 = vsub.s32 6, %v3491_v42 }
 0x185   : > { %2838 = vmatprep.subr.bf16.mxu0 %v3079_v26  ;;  %2860 = vmatprep.subr.bf16.mxu1 %v3080_v27  ;;  %v3135_v25 = vld [vmem:[#allocation6 + $0x34] ss:$12 sps:$4 sm:$0xff]   ;;  %v3133_v27 = vld [vmem:[#allocation6 + $0x30] ss:$12 sps:$4 sm:$0xff]   ;;  %v3166_v53 = vld [vmem:[#allocation6 + $0x2b8] ss:$12 sps:$4 sm:$0xff]  }
 0x186   : > { %v3138_v26 = vld [vmem:[#allocation6 + $0x1b4] ss:$12 sps:$4 sm:$0xff]   ;;  %v3177_v59 = vld [vmem:[#allocation6 + $0x10c] ss:$12 sps:$4 sm:$0xff]   ;;  %v496_v2 = vrot.slane %v3502_v45, %v495_v60 }
 0x187   : > { %v3162_v47 = vld [vmem:[#allocation6 + $0x2d4] ss:$12 sps:$4 sm:$0xff]  }
 0x188   : > { %2839 = vmatpush3.bf16.msra.mxu0 %v3081_v28  ;;  %2861 = vmatpush3.bf16.msra.mxu1 %v3082_v29  ;;  %v3136_v28 = vld [vmem:[#allocation6 + $0x1b0] ss:$12 sps:$4 sm:$0xff]   ;;  %v3183_v1 = vld [vmem:[#allocation6 + $0xf4] ss:$12 sps:$4 sm:$0xff]  }
 0x189   : > { %2840 = vmatprep.subr.bf16.mxu0 %v3083_v30  ;;  %2862 = vmatprep.subr.bf16.mxu1 %v3084_v31  ;;  %v3141_v29 = vld [vmem:[#allocation6 + $0x1c] ss:$12 sps:$4 sm:$0xff]   ;;  %v3139_v31 = vld [vmem:[#allocation6 + $0x18] ss:$12 sps:$4 sm:$0xff]  }
 0x18a   : > { %v3144_v30 = vld [vmem:[#allocation6 + $0x19c] ss:$12 sps:$4 sm:$0xff]  }
 0x18c   : > { %2841 = vmatpush3.bf16.msra.mxu0 %v3085_v32  ;;  %2863 = vmatpush3.bf16.msra.mxu1 %v3086_v33  ;;  %v3142_v32 = vld [vmem:[#allocation6 + $0x198] ss:$12 sps:$4 sm:$0xff]  }
 0x18d   : > { %2842 = vmatprep.subr.bf16.mxu0 %v3087_v34  ;;  %2864 = vmatprep.subr.bf16.mxu1 %v3088_v35  ;;  %v3147_v33 = vld [vmem:[#allocation6 + $0x4] ss:$12 sps:$4 sm:$0xff]   ;;  %v3145_v35 = vld [vmem:[#allocation6] ss:$12 sps:$4 sm:$0xff]  }
 0x18e   : > { %v3150_v34 = vld [vmem:[#allocation6 + $0x184] ss:$12 sps:$4 sm:$0xff]  }
 0x190   : > { %2843 = vmatpush3.bf16.msra.mxu0 %v3089_v38  ;;  %2865 = vmatpush3.bf16.msra.mxu1 %v3090_v39  ;;  %v3156_v38 = vld [vmem:[#allocation6 + $0x2ec] ss:$12 sps:$4 sm:$0xff]   ;;  %v3151_v39 = vld [vmem:[#allocation6 + $0x168] ss:$12 sps:$4 sm:$0xff]  }
 0x191   : > { %2844 = vmatprep.subr.bf16.mxu0 %v3091_v40  ;;  %2866 = vmatprep.subr.bf16.mxu1 %v3092_v41  ;;  %v3154_v40 = vld [vmem:[#allocation6 + $0x2e8] ss:$12 sps:$4 sm:$0xff]  }
 0x192   : > { %v3159_v41 = vld [vmem:[#allocation6 + $0x154] ss:$12 sps:$4 sm:$0xff]  }
 0x194   : > { %2845 = vmatpush3.bf16.msra.mxu0 %v3093_v49  ;;  %2867 = vmatpush3.bf16.msra.mxu1 %v3094_v50  ;;  %v3160_v49 = vld [vmem:[#allocation6 + $0x2d0] ss:$12 sps:$4 sm:$0xff]  }
 0x195   : > { %2846 = vmatprep.subr.bf16.mxu0 %v3095_v51  ;;  %2868 = vmatprep.subr.bf16.mxu1 %v3096_v52  ;;  %v3165_v50 = vld [vmem:[#allocation6 + $0x13c] ss:$12 sps:$4 sm:$0xff]   ;;  %v3163_v52 = vld [vmem:[#allocation6 + $0x138] ss:$12 sps:$4 sm:$0xff]  }
 0x196   : > { %v3168_v51 = vld [vmem:[#allocation6 + $0x2bc] ss:$12 sps:$4 sm:$0xff]  }
 0x198   : > { %2847 = vmatpush3.bf16.msra.mxu0 %v3097_v55  ;;  %2869 = vmatpush3.bf16.msra.mxu1 %v3098_v56  ;;  %v3174_v55 = vld [vmem:[#allocation6 + $0x2a4] ss:$12 sps:$4 sm:$0xff]   ;;  %v3169_v56 = vld [vmem:[#allocation6 + $0x120] ss:$12 sps:$4 sm:$0xff]  }
 0x199   : > { %2848 = vmatprep.subr.bf16.mxu0 %v3099_v57  ;;  %2870 = vmatprep.subr.bf16.mxu1 %v3100_v58  ;;  %v487_v57 = vsub.s32 4, %v3491_v42  ;;  %v3172_v58 = vld [vmem:[#allocation6 + $0x2a0] ss:$12 sps:$4 sm:$0xff]   ;;  %v3184_v42 = vld [vmem:[#allocation6 + $0x270] ss:$12 sps:$4 sm:$0xff]  }
 0x19c   : > { %2849 = vmatpush3.bf16.msra.mxu0 %v3101_v61  ;;  %2871 = vmatpush3.bf16.msra.mxu1 %v3102_v62  ;;  %v3180_v61 = vld [vmem:[#allocation6 + $0x28c] ss:$12 sps:$4 sm:$0xff]   ;;  %v3175_v62 = vld [vmem:[#allocation6 + $0x108] ss:$12 sps:$4 sm:$0xff]  }
 0x19d   : > { %2268 = vmatprep.subr.bf16.mxu0 %v3105_v63  ;;  %2309 = vmatprep.subr.bf16.mxu1 %v3108_v0  ;;  %v488_v63 = vrot.slane %v3502_v45, %v487_v57  ;;  %v3178_v0 = vld [vmem:[#allocation6 + $0x288] ss:$12 sps:$4 sm:$0xff]   ;;  %v3190_v45 = vld [vmem:[#allocation6 + $0x258] ss:$12 sps:$4 sm:$0xff]  }
 0x19f   : > { %1558 = vmatmul.mubr.bf16.vlgmr.msra.gmra.mxu0 %v3519_v14  ;;  %1598 = vmatmul.mubr.bf16.vlgmr.msra.gmra.mxu1 %v3521_v15  ;;  %v3123_v14 = vld [vmem:[#allocation6 + $0x64] ss:$12 sps:$4 sm:$0xff]  }
 0x1a0   : > { %2269 = vmatpush1.bf16.msra.mxu0 %v3103_v3  ;;  %2300 = vmatprep.mubr.bf16.mxu0 %v3529_v5  ;;  %v3126_v15 = vld [vmem:[#allocation6 + $0x1e4] ss:$12 sps:$4 sm:$0xff]   ;;  %v3186_v3 = vld [vmem:[#allocation6 + $0x274] ss:$12 sps:$4 sm:$0xff]  }
 0x1a1   : > { %2310 = vmatpush1.bf16.msra.mxu1 %v3106_v4  ;;  %2341 = vmatprep.mubr.bf16.mxu1 %v3531_v10  ;;  %v3181_v4 = vld [vmem:[#allocation6 + $0xf0] ss:$12 sps:$4 sm:$0xff]  }
 0x1a2   : > { %2270 = vmatprep.subr.bf16.mxu0 %v3111_v6  ;;  %2311 = vmatprep.subr.bf16.mxu1 %v3114_v7  ;;  %v715_v6 = vadd.f32 %v3515_v8, %v488_v63  ;;  %v3189_v7 = vld [vmem:[#allocation6 + $0xdc] ss:$12 sps:$4 sm:$0xff]   ;;  %v3193_v8 = vld [vmem:[#allocation6 + $0xc0] ss:$12 sps:$4 sm:$0xff]  }
 0x1a4   : > { %2271 = vmatpush1.bf16.msra.mxu0 %v3109_v11  ;;  %v756_v11 = vadd.f32 %v3517_v9, %v496_v2 }
 0x1a5   : > { %2312 = vmatpush1.bf16.msra.mxu1 %v3112_v12  ;;  %2272 = vmatprep.subr.bf16.mxu0 %v3117_v13  ;;  %v3192_v12 = vld [vmem:[#allocation6 + $0x25c] ss:$12 sps:$4 sm:$0xff]   ;;  %v3187_v13 = vld [vmem:[#allocation6 + $0xd8] ss:$12 sps:$4 sm:$0xff]  }
 0x1a6   : > { %2313 = vmatprep.subr.bf16.mxu1 %v3120_v16  ;;  %v766_v16 = vmul.f32 0.01, %v715_v6 }
 0x1a8   : > { %2273 = vmatpush1.bf16.msra.mxu0 %v3115_v17  ;;  %v3195_v17 = vld [vmem:[#allocation6 + $0xc4] ss:$12 sps:$4 sm:$0xff]  }
 0x1a9   : > { %2314 = vmatpush1.bf16.msra.mxu1 %v3118_v18  ;;  %2274 = vmatprep.subr.bf16.mxu0 %v3123_v14  ;;  %v768_v18 = vmul.f32 0.01, %v756_v11  ;;  %v3198_v14 = vld [vmem:[#allocation6 + $0x244] ss:$12 sps:$4 sm:$0xff]  }
 0x1aa   : > { %2315 = vmatprep.subr.bf16.mxu1 %v3126_v15  ;;  %v774_v15 = vmax.f32 %v715_v6, %v766_v16 }
 0x1ab   : > { %v776_v9 = vmax.f32 %v756_v11, %v768_v18 }
 0x1ac   : > { %2275 = vmatpush1.bf16.msra.mxu0 %v3121_v19  ;;  %v3196_v19 = vld [vmem:[#allocation6 + $0x240] ss:$12 sps:$4 sm:$0xff]  }
 0x1ad   : > { %2316 = vmatpush1.bf16.msra.mxu1 %v3124_v20  ;;  %2276 = vmatprep.subr.bf16.mxu0 %v3129_v21  ;;  %v3199_v20 = vld [vmem:[#allocation6 + $0x170] ss:$12 sps:$4 sm:$0xff]  }
 0x1ae   : > { %2317 = vmatprep.subr.bf16.mxu1 %v3132_v22  ;;  %v3200_v21 = vld [vmem:[#allocation6 + $0x2f0] ss:$12 sps:$4 sm:$0xff]  }
 0x1af   : > { %v3201_v22 = vld [vmem:[#allocation6 + $0xb0] ss:$12 sps:$4 sm:$0xff]  }
 0x1b0   : > { %2277 = vmatpush1.bf16.msra.mxu0 %v3127_v23  ;;  %v3543_v23 = vpack.c.bf16 %v774_v15, %v774_v15 }
 0x1b1   : > { %2318 = vmatpush1.bf16.msra.mxu1 %v3130_v24  ;;  %2278 = vmatprep.subr.bf16.mxu0 %v3135_v25  ;;  %v3202_v24 = vld [vmem:[#allocation6 + $0x230] ss:$12 sps:$4 sm:$0xff]   ;;  %v3545_v25 = vpack.c.bf16 %v776_v9, %v776_v9 }
 0x1b2   : > { %2319 = vmatprep.subr.bf16.mxu1 %v3138_v26  ;;  %v3203_v26 = vld [vmem:[#allocation6 + $0x158] ss:$12 sps:$4 sm:$0xff]  }
 0x1b4   : > { %2279 = vmatpush1.bf16.msra.mxu0 %v3133_v27  ;;  %v3204_v27 = vld [vmem:[#allocation6 + $0x2d8] ss:$12 sps:$4 sm:$0xff]  }
 0x1b5   : > { %2320 = vmatpush1.bf16.msra.mxu1 %v3136_v28  ;;  %2280 = vmatprep.subr.bf16.mxu0 %v3141_v29  ;;  %v3205_v28 = vld [vmem:[#allocation6 + $0x98] ss:$12 sps:$4 sm:$0xff]  }
 0x1b6   : > { %2321 = vmatprep.subr.bf16.mxu1 %v3144_v30  ;;  %v3206_v29 = vld [vmem:[#allocation6 + $0x218] ss:$12 sps:$4 sm:$0xff]   ;;  %v3207_v30 = vld [vmem:[#allocation6 + $0x140] ss:$12 sps:$4 sm:$0xff]  }
 0x1b8   : > { %2281 = vmatpush1.bf16.msra.mxu0 %v3139_v31  ;;  %v3208_v31 = vld [vmem:[#allocation6 + $0x2c0] ss:$12 sps:$4 sm:$0xff]  }
 0x1b9   : > { %2322 = vmatpush1.bf16.msra.mxu1 %v3142_v32  ;;  %2282 = vmatprep.subr.bf16.mxu0 %v3147_v33  ;;  %v3209_v32 = vld [vmem:[#allocation6 + $0x80] ss:$12 sps:$4 sm:$0xff]  }
 0x1ba   : > { %2323 = vmatprep.subr.bf16.mxu1 %v3150_v34  ;;  %v3210_v33 = vld [vmem:[#allocation6 + $0x200] ss:$12 sps:$4 sm:$0xff]   ;;  %v3211_v34 = vld [vmem:[#allocation6 + $0x128] ss:$12 sps:$4 sm:$0xff]  }
 0x1bc   : > { %2283 = vmatpush1.bf16.msra.mxu0 %v3145_v35  ;;  %v3212_v35 = vld [vmem:[#allocation6 + $0x2a8] ss:$12 sps:$4 sm:$0xff]  }
 0x1bd   : > { %2324 = vmatpush1.bf16.msra.mxu1 %v3148_v36  ;;  %2284 = vmatprep.subr.bf16.mxu0 %v3153_v37  ;;  %v3213_v36 = vld [vmem:[#allocation6 + $0x68] ss:$12 sps:$4 sm:$0xff]   ;;  %v3215_v37 = vld [vmem:[#allocation6 + $0x110] ss:$12 sps:$4 sm:$0xff]  }
 0x1be   : > { %2325 = vmatprep.subr.bf16.mxu1 %v3156_v38  ;;  %v3216_v38 = vld [vmem:[#allocation6 + $0x290] ss:$12 sps:$4 sm:$0xff]  }
 0x1c0   : > { %2285 = vmatpush2.bf16.msra.mxu0 %v3151_v39  ;;  %v3218_v39 = vld [vmem:[#allocation6 + $0x1d0] ss:$12 sps:$4 sm:$0xff]  }
 0x1c1   : > { %2326 = vmatpush2.bf16.msra.mxu1 %v3154_v40  ;;  %2286 = vmatprep.subr.bf16.mxu0 %v3159_v41  ;;  %v3219_v40 = vld [vmem:[#allocation6 + $0xf8] ss:$12 sps:$4 sm:$0xff]  }
 0x1c2   : > { %2327 = vmatprep.subr.bf16.mxu1 %v3162_v47  ;;  %v3220_v41 = vld [vmem:[#allocation6 + $0x278] ss:$12 sps:$4 sm:$0xff]  }
 0x1c3   : > { %v3221_v47 = vld [vmem:[#allocation6 + $0x38] ss:$12 sps:$4 sm:$0xff]  }
 0x1c4   : > { %2287 = vmatpush2.bf16.msra.mxu0 %v3157_v48  ;;  %v3222_v48 = vld [vmem:[#allocation6 + $0x1b8] ss:$12 sps:$4 sm:$0xff]  }
 0x1c5   : > { %2328 = vmatpush2.bf16.msra.mxu1 %v3160_v49  ;;  %2288 = vmatprep.subr.bf16.mxu0 %v3165_v50  ;;  %v3223_v49 = vld [vmem:[#allocation6 + $0xe0] ss:$12 sps:$4 sm:$0xff]  }
 0x1c6   : > { %2329 = vmatprep.subr.bf16.mxu1 %v3168_v51  ;;  %v3224_v50 = vld [vmem:[#allocation6 + $0x260] ss:$12 sps:$4 sm:$0xff]  }
 0x1c7   : > { %v3225_v51 = vld [vmem:[#allocation6 + $0x20] ss:$12 sps:$4 sm:$0xff]  }
 0x1c8   : > { %2289 = vmatpush2.bf16.msra.mxu0 %v3163_v52  ;;  %v3226_v52 = vld [vmem:[#allocation6 + $0x1a0] ss:$12 sps:$4 sm:$0xff]  }
 0x1c9   : > { %2330 = vmatpush2.bf16.msra.mxu1 %v3166_v53  ;;  %2290 = vmatprep.subr.bf16.mxu0 %v3171_v54  ;;  %v3227_v53 = vld [vmem:[#allocation6 + $0xc8] ss:$12 sps:$4 sm:$0xff]  }
 0x1ca   : > { %2331 = vmatprep.subr.bf16.mxu1 %v3174_v55  ;;  %v3228_v54 = vld [vmem:[#allocation6 + $0x248] ss:$12 sps:$4 sm:$0xff]  }
 0x1cb   : > { %v3229_v55 = vld [vmem:[#allocation6 + $0x8] ss:$12 sps:$4 sm:$0xff]  }
 0x1cc   : > { %2291 = vmatpush2.bf16.msra.mxu0 %v3169_v56  ;;  %v3230_v56 = vld [vmem:[#allocation6 + $0x188] ss:$12 sps:$4 sm:$0xff]  }
 0x1cd   : > { %2332 = vmatpush2.bf16.msra.mxu1 %v3172_v58  ;;  %2292 = vmatprep.subr.bf16.mxu0 %v3177_v59 }
 0x1ce   : > { %2333 = vmatprep.subr.bf16.mxu1 %v3180_v61 }
 0x1d0   : > { %2293 = vmatpush2.bf16.msra.mxu0 %v3175_v62 }
 0x1d1   : > { %2334 = vmatpush2.bf16.msra.mxu1 %v3178_v0  ;;  %2294 = vmatprep.subr.bf16.mxu0 %v3183_v1  ;;  %v914_v1 = vld [vmem:[%s3592_s5] sm:$0x7] }
 0x1d2   : > { %2335 = vmatprep.subr.bf16.mxu1 %v3186_v3  ;;  %v923_v2 = vrot.slane %v914_v1, %v3505_v46  ;;  %v919_v3 = vrot.slane %v914_v1, %v3494_v43  ;;  %v927_v16 = vrot.slane %v914_v1, %v3497_v44 }
 0x1d4   : > { %2295 = vmatpush2.bf16.msra.mxu0 %v3181_v4 }
 0x1d5   : > { %2336 = vmatpush2.bf16.msra.mxu1 %v3184_v42  ;;  %2296 = vmatprep.subr.bf16.mxu0 %v3189_v7 }
 0x1d6   : > { %2337 = vmatprep.subr.bf16.mxu1 %v3192_v12 }
 0x1d8   : > { %2297 = vmatpush2.bf16.msra.mxu0 %v3187_v13 }
 0x1d9   : > { %2338 = vmatpush2.bf16.msra.mxu1 %v3190_v45  ;;  %2298 = vmatprep.subr.bf16.mxu0 %v3195_v17 }
 0x1da   : > { %2339 = vmatprep.subr.bf16.mxu1 %v3198_v14 }
 0x1dc   : > { %2299 = vmatpush2.bf16.msra.mxu0 %v3193_v8  ;;  %v2436_v8 = vld [vmem:[%s3595_s8] sm:$0x7] }
 0x1dd   : > { %2340 = vmatpush2.bf16.msra.mxu1 %v3196_v19  ;;  %2878 = vmatprep.subr.bf16.mxu0 %v3199_v20  ;;  %v2445_v9 = vrot.slane %v2436_v8, %v3505_v46 }
 0x1de   : > { %2900 = vmatprep.subr.bf16.mxu1 %v3200_v21 }
 0x1df   : > { %2301 = vmatmul.mubr.bf16.vlgmr.msra.gmra.mxu0 %v3543_v23 }
 0x1e0   : > { %2342 = vmatmul.mubr.bf16.vlgmr.msra.gmra.mxu1 %v3545_v25  ;;  %2879 = vmatpush3.bf16.msra.mxu0 %v3201_v22 }
 0x1e1   : > { %2382 = vmatprep.mubr.bf16.mxu0 %v3529_v5  ;;  %2901 = vmatpush3.bf16.msra.mxu1 %v3202_v24  ;;  %v3214_v5 = vld [vmem:[#allocation6 + $0x1e8] ss:$12 sps:$4 sm:$0xff]  }
 0x1e2   : > { %2422 = vmatprep.mubr.bf16.mxu1 %v3531_v10  ;;  %2880 = vmatprep.subr.bf16.mxu0 %v3203_v26  ;;  %v3217_v10 = vld [vmem:[#allocation6 + $0x50] ss:$12 sps:$4 sm:$0xff]   ;;  %v2441_v26 = vrot.slane %v2436_v8, %v3494_v43 }
 0x1e3   : > { %2902 = vmatprep.subr.bf16.mxu1 %v3204_v27 }
 0x1e4   : > { %2881 = vmatpush3.bf16.msra.mxu0 %v3205_v28 }
 0x1e5   : > { %2903 = vmatpush3.bf16.msra.mxu1 %v3206_v29  ;;  %2882 = vmatprep.subr.bf16.mxu0 %v3207_v30  ;;  %v2449_v30 = vrot.slane %v2436_v8, %v3497_v44 }
 0x1e6   : > { %2904 = vmatprep.subr.bf16.mxu1 %v3208_v31 }
 0x1e8   : > { %2883 = vmatpush3.bf16.msra.mxu0 %v3209_v32 }
 0x1e9   : > { %2905 = vmatpush3.bf16.msra.mxu1 %v3210_v33  ;;  %2884 = vmatprep.subr.bf16.mxu0 %v3211_v34 }
 0x1ea   : > { %2906 = vmatprep.subr.bf16.mxu1 %v3212_v35 }
 0x1ec   : > { %2885 = vmatpush3.bf16.msra.mxu0 %v3213_v36 }
 0x1ed   : > { %2907 = vmatpush3.bf16.msra.mxu1 %v3214_v5  ;;  %2886 = vmatprep.subr.bf16.mxu0 %v3215_v37 }
 0x1ee   : > { %2908 = vmatprep.subr.bf16.mxu1 %v3216_v38 }
 0x1f0   : > { %2887 = vmatpush3.bf16.msra.mxu0 %v3217_v10 }
 0x1f1   : > { %2909 = vmatpush3.bf16.msra.mxu1 %v3218_v39  ;;  %2888 = vmatprep.subr.bf16.mxu0 %v3219_v40 }
 0x1f2   : > { %2910 = vmatprep.subr.bf16.mxu1 %v3220_v41 }
 0x1f4   : > { %2889 = vmatpush3.bf16.msra.mxu0 %v3221_v47  ;;  %v1739_v47 = vld [vmem:[%s3594_s7] sm:$0x7] }
 0x1f5   : > { %2911 = vmatpush3.bf16.msra.mxu1 %v3222_v48  ;;  %2890 = vmatprep.subr.bf16.mxu0 %v3223_v49  ;;  %v1748_v48 = vrot.slane %v1739_v47, %v3505_v46  ;;  %v1744_v49 = vrot.slane %v1739_v47, %v3494_v43 }
 0x1f6   : > { %2912 = vmatprep.subr.bf16.mxu1 %v3224_v50 }
 0x1f8   : > { %2891 = vmatpush3.bf16.msra.mxu0 %v3225_v51 }
 0x1f9   : > { %2913 = vmatpush3.bf16.msra.mxu1 %v3226_v52  ;;  %2892 = vmatprep.subr.bf16.mxu0 %v3227_v53 }
 0x1fa   : > { %2914 = vmatprep.subr.bf16.mxu1 %v3228_v54 }
 0x1fc   : > { %2893 = vmatpush3.bf16.msra.mxu0 %v3229_v55 }
 0x1fd   : > { %2915 = vmatpush3.bf16.msra.mxu1 %v3230_v56 }
 0x1ff   : > { %2383 = vmatmul.mubr.bf16.vlgmr.msra.gmra.mxu0 %v3543_v23 }
 0x200   : > { %2423 = vmatmul.mubr.bf16.vlgmr.msra.gmra.mxu1 %v3545_v25 }
 0x23f   : > { %v1477_v57 = vpop.f32.mrf.mxu0  ;;  %v1518_v58 = vpop.f32.mrf.mxu1 }
 0x240   : > { %v1478_v6 = vadd.f32 %v1477_v57, %v919_v3  ;;  %v1752_v57 = vrot.slane %v1739_v47, %v3497_v44 }
 0x241   : > { %v1479_v59 = vpop.f32.mrf.mxu0  ;;  %v1520_v60 = vpop.f32.mrf.mxu1 }
 0x242   : > { %v1480_v4 = vadd.f32 %v1479_v59, %v923_v2  ;;  %v1519_v7 = vadd.f32 %v1518_v58, %v1478_v6 }
 0x243   : > { %v1481_v61 = vpop.f32.mrf.mxu0  ;;  %v1522_v62 = vpop.f32.mrf.mxu1 }
 0x244   : > { %v1521_v42 = vadd.f32 %v1520_v60, %v1480_v4  ;;  %v1605_v18 = vmul.f32 0.01, %v1519_v7 }
 0x245   : > { %v1482_v63 = vpop.f32.mrf.mxu0  ;;  %v1523_v0 = vpop.f32.mrf.mxu1 }
 0x246   : > { %v1606_v13 = vmul.f32 0.01, %v1521_v42  ;;  %v1608_v25 = vmax.f32 %v1519_v7, %v1605_v18  ;;  %v2460_v63 = vld [vmem:[%s3596_s9] sm:$0x7] }
 0x247   : > { %v2469_v4 = vrot.slane %v2460_v63, %v3505_v46  ;;  %v2830_v46 = vld [vmem:[%s3597_s10] ss:$0 sm:$0xff] }
 0x248   : > { %v1609_v20 = vmax.f32 %v1521_v42, %v1606_v13  ;;  %v2453_v31 = vmul.f32 %v2441_v26, %v1608_v25 }
 0x24a   : > { %v2454_v28 = vmul.f32 %v2445_v9, %v1609_v20 }
 0x24c   : > { %v2456_v34 = vadd.f32 %v2454_v28, %v2453_v31 }
 0x25f   : > { %v2850_v11 = vpop.f32.mrf.mxu0  ;;  %v2872_v12 = vpop.f32.mrf.mxu1 }
 0x261   : > { %v2851_v45 = vpop.f32.mrf.mxu0  ;;  %v2873_v17 = vpop.f32.mrf.mxu1 }
 0x262   : > { %v2852_v14 = vadd.f32 %v2851_v45, %v2850_v11  ;;  %v2874_v22 = vadd.f32 %v2873_v17, %v2872_v12  ;;  %v2465_v12 = vrot.slane %v2460_v63, %v3494_v43 }
 0x263   : > { %v2853_v15 = vpop.f32.mrf.mxu0  ;;  %v2875_v19 = vpop.f32.mrf.mxu1 }
 0x264   : > { %v1560_v21 = vadd.f32 %v2852_v14, %v927_v16  ;;  %v2473_v16 = vrot.slane %v2460_v63, %v3497_v44 }
 0x265   : > { %v2854_v23 = vpop.f32.mrf.mxu0  ;;  %v2876_v24 = vpop.f32.mrf.mxu1 }
 0x266   : > { %v1600_v27 = vadd.f32 %v2874_v22, %v1560_v21 }
 0x268   : > { %v1607_v29 = vmul.f32 0.01, %v1600_v27 }
 0x26a   : > { %v1610_v32 = vmax.f32 %v1600_v27, %v1607_v29 }
 0x26c   : > { %v2455_v33 = vmul.f32 %v2449_v30, %v1610_v32 }
 0x26e   : > { %v2457_v35 = vadd.f32 %v2456_v34, %v2455_v33 }
 0x270   : > { %2458 = vadd.xlane.f32.xlu0 %v2457_v35 }
 0x29f   : > { %v2302_v36 = vpop.f32.mrf.mxu0 }
 0x2a0   : > { %v2343_v5 = vpop.f32.mrf.mxu1  ;;  %v2303_v51 = vadd.f32 %v2302_v36, %v1744_v49 }
 0x2a1   : > { %v2304_v37 = vpop.f32.mrf.mxu0 }
 0x2a2   : > { %v2345_v38 = vpop.f32.mrf.mxu1  ;;  %v2305_v50 = vadd.f32 %v2304_v37, %v1748_v48  ;;  %v2344_v53 = vadd.f32 %v2343_v5, %v2303_v51 }
 0x2a3   : > { %v2306_v10 = vpop.f32.mrf.mxu0 }
 0x2a4   : > { %v2347_v39 = vpop.f32.mrf.mxu1  ;;  %v2346_v52 = vadd.f32 %v2345_v38, %v2305_v50  ;;  %v2430_v59 = vmul.f32 0.01, %v2344_v53 }
 0x2a5   : > { %v2307_v40 = vpop.f32.mrf.mxu0 }
 0x2a6   : > { %v2348_v41 = vpop.f32.mrf.mxu1  ;;  %v2431_v55 = vmul.f32 0.01, %v2346_v52  ;;  %v2433_v42 = vmax.f32 %v2344_v53, %v2430_v59 }
 0x2a8   : > { %v2434_v0 = vmax.f32 %v2346_v52, %v2431_v55  ;;  %v2477_v18 = vmul.f32 %v2465_v12, %v2433_v42 }
 0x2aa   : > { %v2478_v45 = vmul.f32 %v2469_v4, %v2434_v0 }
 0x2ac   : > { %v2480_v8 = vadd.f32 %v2478_v45, %v2477_v18 }
 0x2bf   : > { %v2894_v54 = vpop.f32.mrf.mxu0 }
 0x2c0   : > { %v2916_v56 = vpop.f32.mrf.mxu1 }
 0x2c1   : > { %v2895_v58 = vpop.f32.mrf.mxu0 }
 0x2c2   : > { %v2896_v60 = vadd.f32 %v2895_v58, %v2894_v54  ;;  %v2917_v61 = vpop.f32.mrf.mxu1 }
 0x2c3   : > { %v2897_v62 = vpop.f32.mrf.mxu0  ;;  %v2918_v2 = vadd.f32 %v2917_v61, %v2916_v56 }
 0x2c4   : > { %v2385_v1 = vadd.f32 %v2896_v60, %v1752_v57  ;;  %v2919_v3 = vpop.f32.mrf.mxu1 }
 0x2c5   : > { %v2898_v6 = vpop.f32.mrf.mxu0 }
 0x2c6   : > { %v2425_v7 = vadd.f32 %v2918_v2, %v2385_v1  ;;  %v2920_v11 = vpop.f32.mrf.mxu1 }
 0x2c8   : > { %v2432_v13 = vmul.f32 0.01, %v2425_v7 }
 0x2ca   : > { %v2435_v17 = vmax.f32 %v2425_v7, %v2432_v13 }
 0x2cc   : > { %v2479_v14 = vmul.f32 %v2473_v16, %v2435_v17 }
 0x2ce   : > { %v2481_v15 = vadd.f32 %v2480_v8, %v2479_v14 }
 0x2d0   : > { %2482 = vadd.xlane.f32.xlu1 %v2481_v15 }
 0x2f9   : > { %v2459_v43 = vpop.xlane.xlu0 %2458 }
 0x2fa   : > { %v2491_v19 = vadd.f32 %v2830_v46, %v2459_v43 }
 0x2fc   : > { %2493 = vst.msk [vmem:[%s442_s20] sm:$0xff] %vm2492_vm4, %v2491_v19 }
 0x359   : > { %v2483_v44 = vpop.xlane.xlu1 %2482 }
 0x35a   : > { %v2501_v20 = vadd.f32 %v2830_v46, %v2483_v44 }
 0x35c   : > { %2503 = vst.msk [vmem:[%s442_s20] sm:$0xff] %vm2502_vm5, %v2501_v20 }
 0x35d PF: > { %s23_s17 = sadd.s32 1, %s3323_s17  }
 0x35e   : > { %p20_p2 = scmp.ge.s32.totalorder %s23_s17, 4  }
 0x360   :  { %22 = sbr.rel (!%p20_p2) target bundleno = 2 (0x2), region = 110 }
 0x365   :  { %2523 = vsyncpa [#allocation3], 1 }
 0x366   :  { %2525 = vsyncpa [#allocation3 + $0x1], 1 }
 0x367   :  { %2526 = vsyncpa [#allocation5], 1 }

</bundles_post_ra>
